<compile_context>
chip_gen: v6e
topology: v6e:2x2x1
jax: 0.10.0
libtpu: 0.0.40
codegen_flags: <defaults>
</compile_context>

<pallas_src>
import functools
import math

import jax
import jax.numpy as jnp
from jax import lax
from jax.experimental import pallas as pl
from jax.experimental.pallas import tpu as pltpu


def _round_up(x, m):
    return -(-x // m) * m


# --------------------------------------------------------------------------------------
# Fast path: embedding table resident in VMEM, gather with dynamic VMEM row reads.
# --------------------------------------------------------------------------------------
def _embedding_vmem_kernel(tok_ref, table_ref, out_ref, *, tn, vocab, scale):
    # tok_ref:   (N_pad,) int32 in SMEM (scalar-prefetched token ids)
    # table_ref: (V, D) table block, loaded into VMEM once (constant index_map)
    # out_ref:   (TN, D) float32 VMEM output tile
    i = pl.program_id(0)
    base = i * tn

    def chunk_body(c, carry):
        r0 = pl.multiple_of(c * 8, 8)
        rows = []
        for r in range(8):
            t = jnp.clip(tok_ref[base + r0 + r], 0, vocab - 1)
            rows.append(table_ref[pl.ds(t, 1), :])
        block = jnp.concatenate(rows, axis=0).astype(jnp.float32)
        # 8-row-aligned chunk -> full-sublane (unmasked) store.
        out_ref[pl.ds(r0, 8), :] = block * jnp.float32(scale)
        return carry

    lax.fori_loop(0, tn // 8, chunk_body, 0, unroll=False)


# --------------------------------------------------------------------------------------
# Large-table path: table stays in HBM, per-row DMA gather directly into out_ref.
# --------------------------------------------------------------------------------------
def _embedding_hbm_kernel(tok_ref, emb_hbm, out_ref, copy_sems, *, tn, vocab, n_dma, scale):
    # tok_ref:   (N_pad,) int32 in SMEM (scalar-prefetched token ids)
    # emb_hbm:   (V, D) float32 ref left in HBM (memory_space=pl.ANY)
    # out_ref:   (TN, D) float32 VMEM output tile (also the DMA landing buffer)
    # copy_sems: (N_DMA,) DMA semaphores (one per in-flight row copy slot)
    i = pl.program_id(0)
    base = i * tn

    def issue(t):
        tok = jnp.clip(tok_ref[base + t], 0, vocab - 1)   # guard against OOB ids
        pltpu.make_async_copy(
            emb_hbm.at[pl.ds(tok, 1), :],                 # one (1, D) row from HBM
            out_ref.at[pl.ds(t, 1), :],                   # straight into the output tile
            copy_sems.at[t % n_dma],
        ).start()

    def wait(t):
        # Shape-only descriptor: .wait() only needs the transfer size and semaphore slot
        # (all copies are identical (1, D) rows), so use a fixed source row instead of
        # re-reading the token id from SMEM after a wait.
        pltpu.make_async_copy(
            emb_hbm.at[pl.ds(0, 1), :],
            out_ref.at[pl.ds(t, 1), :],
            copy_sems.at[t % n_dma],
        ).wait()

    # Prologue: fill the in-flight DMA window.
    def prolog_body(t, carry):
        issue(t)
        return carry

    lax.fori_loop(0, n_dma, prolog_body, 0, unroll=True)

    n_chunks = tn // 8
    steady = (tn - n_dma) // 8   # chunks that still have a full chunk to re-issue ahead

    # Steady state: per 8-row chunk, wait its copies, re-issue the copies n_dma rows
    # ahead (reusing the just-freed semaphore slots), then scale the finished chunk in
    # place -- the multiply/store hides under the still-in-flight DMAs.
    def steady_body(c, carry):
        r0 = pl.multiple_of(c * 8, 8)
        for r in range(8):
            wait(r0 + r)
        for r in range(8):
            issue(r0 + r + n_dma)
        out_ref[pl.ds(r0, 8), :] = out_ref[pl.ds(r0, 8), :] * jnp.float32(scale)
        return carry

    lax.fori_loop(0, steady, steady_body, 0, unroll=False)

    # Tail: nothing left to issue; drain + scale the last n_dma rows chunk by chunk.
    def tail_body(c, carry):
        r0 = pl.multiple_of(c * 8, 8)
        for r in range(8):
            wait(r0 + r)
        out_ref[pl.ds(r0, 8), :] = out_ref[pl.ds(r0, 8), :] * jnp.float32(scale)
        return carry

    lax.fori_loop(steady, n_chunks, tail_body, 0, unroll=False)


# --------------------------------------------------------------------------------------
# Wrapper
# --------------------------------------------------------------------------------------
def embedding_layer(x, emb_table, *, tn=None, n_dma=32,
                    vmem_table_limit_bytes=8 * 1024 * 1024,
                    out_tile_target_bytes=1 << 20):
    """x: (batch, seq) int token ids; emb_table: (d_input, d_model).

    Returns (batch, seq, d_model) f32 = emb_table[x] * sqrt(d_model).
    """
    batch, seq = x.shape
    vocab, d_model = emb_table.shape
    n = batch * seq
    scale = float(math.sqrt(d_model))

    # --- token-tile selection: big tiles (target ~1 MiB of output per grid step),
    # but keep >= 2 grid steps when there is enough work (v7x megacore split).
    rows = _round_up(max(n, 1), 8)
    if tn is None:
        tn = max(8, (out_tile_target_bytes // (d_model * 4)) // 8 * 8)
        tn = min(tn, rows)
        if tn >= rows and rows >= 16:
            tn = _round_up(-(-rows // 2), 8)
    tn = max(8, _round_up(int(tn), 8))

    n_pad = _round_up(n, tn)
    tok = x.reshape(n).astype(jnp.int32)
    if n_pad != n:
        tok = jnp.pad(tok, (0, n_pad - n))   # padded ids gather row 0, sliced off below
    grid = (n_pad // tn,)

    table_bytes = vocab * d_model * emb_table.dtype.itemsize
    tile_bytes = tn * d_model * 4
    use_vmem_table = table_bytes <= vmem_table_limit_bytes

    if use_vmem_table:
        kernel = functools.partial(
            _embedding_vmem_kernel, tn=tn, vocab=vocab, scale=scale)
        in_specs = [pl.BlockSpec((vocab, d_model), lambda i, tok: (0, 0))]
        scratch_shapes = []
        bytes_accessed = table_bytes + n_pad * d_model * 4 + n_pad * 4
        vmem_need = 2 * table_bytes + 2 * tile_bytes
    else:
        if emb_table.dtype != jnp.float32:
            emb_table = emb_table.astype(jnp.float32)   # DMA dst (out tile) is f32
        n_dma = max(8, (min(int(n_dma), tn) // 8) * 8)  # window <= tn, multiple of 8
        kernel = functools.partial(
            _embedding_hbm_kernel, tn=tn, vocab=vocab, n_dma=n_dma, scale=scale)
        in_specs = [pl.BlockSpec(memory_space=pl.ANY)]  # table stays in HBM
        scratch_shapes = [pltpu.SemaphoreType.DMA((n_dma,))]
        bytes_accessed = 2 * n_pad * d_model * 4 + n_pad * 4
        vmem_need = 2 * tile_bytes

    # Track actual need (double-buffered output + resident table) with headroom,
    # capped at 64 MiB so it is also valid on v7x's smaller VMEM.
    vmem_limit = int(min(64 * 1024 * 1024, max(32 * 1024 * 1024, 2 * vmem_need)))

    out_flat = pl.pallas_call(
        kernel,
        out_shape=jax.ShapeDtypeStruct((n_pad, d_model), jnp.float32),
        grid_spec=pltpu.PrefetchScalarGridSpec(
            num_scalar_prefetch=1,                        # token ids -> SMEM
            grid=grid,
            in_specs=in_specs,
            out_specs=pl.BlockSpec((tn, d_model), lambda i, tok: (i, 0)),
            scratch_shapes=scratch_shapes,
        ),
        compiler_params=pltpu.CompilerParams(
            dimension_semantics=("parallel",),            # shard token tiles across TCs
            vmem_limit_bytes=vmem_limit,
        ),
        cost_estimate=pl.CostEstimate(
            flops=n_pad * d_model,                        # just the scale multiply
            transcendentals=0,
            bytes_accessed=int(bytes_accessed),
        ),
    )(tok, emb_table)

    return out_flat[:n].reshape(batch, seq, d_model)


if __name__ == "__main__":
    d_input = 64     # vocab size
    d_model = 128    # embedding width (multiple of 128 -> lane-dense rows)
    batch, seq = 2, 8

    key = jax.random.PRNGKey(0)
    k_w, k_x = jax.random.split(key)

    emb_table = jax.random.normal(k_w, (d_input, d_model), dtype=jnp.float32)
    x = jax.random.randint(k_x, (batch, seq), minval=0, maxval=d_input,
                           dtype=jnp.int32)

    ref = emb_table[x] * jnp.float32(math.sqrt(d_model))

    # Fast path: table resident in VMEM.
    out_fast = jax.block_until_ready(embedding_layer(x, emb_table))
    assert out_fast.shape == (batch, seq, d_model)
    assert jnp.allclose(out_fast, ref, atol=1e-5, rtol=1e-5)

    # Large-vocab path (forced): per-row HBM DMA gather straight into the output tile.
    out_dma = jax.block_until_ready(
        embedding_layer(x, emb_table, vmem_table_limit_bytes=0))
    assert jnp.allclose(out_dma, ref, atol=1e-5, rtol=1e-5)

    print("KERNEL_OK")
</pallas_src>

<mosaic_0001>
module attributes {stable_mosaic.version = 11 : i64} {
  func.func @_embedding_vmem_kernel(%arg0: i32, %arg1: memref<16xi32, #tpu.memory_space<smem>>, %arg2: memref<64x128xf32, #tpu.memory_space<vmem>>, %arg3: memref<8x128xf32, #tpu.memory_space<vmem>>) attributes {dimension_semantics = [#tpu.dimension_semantics<parallel>], iteration_bounds = array<i64: 2>, scalar_prefetch = 1 : i64, scratch_operands = 0 : i64, tpu.core_type = #tpu.core_type<tc>, window_params = [{pipeline_mode = #tpu.pipeline_mode<synchronous>, transform_indices = @transform_0, window_bounds = array<i64: 64, 128>}, {transform_indices = @transform_1, window_bounds = array<i64: 8, 128>}]} {
    %c8_i32 = arith.constant 8 : i32
    %0 = arith.muli %arg0, %c8_i32 : i32
    %c0_i32 = arith.constant 0 : i32
    %c8_i32_0 = arith.constant 8 : i32
    %1 = arith.muli %c0_i32, %c8_i32_0 : i32
    %2 = tpu.assume_multiple %1, 8 : i32
    %3 = arith.addi %0, %2 : i32
    %c0_i32_1 = arith.constant 0 : i32
    %4 = arith.addi %3, %c0_i32_1 : i32
    %5 = arith.index_cast %4 : i32 to index
    %6 = memref.load %arg1[%5] : memref<16xi32, #tpu.memory_space<smem>>
    %c0_i32_2 = arith.constant 0 : i32
    %c63_i32 = arith.constant 63 : i32
    %7 = arith.maxsi %c0_i32_2, %6 : i32
    %8 = arith.minsi %c63_i32, %7 : i32
    %9 = arith.index_cast %8 : i32 to index
    %c0 = arith.constant 0 : index
    %10 = vector.load %arg2[%9, %c0] : memref<64x128xf32, #tpu.memory_space<vmem>>, vector<1x128xf32>
    %11 = arith.addi %0, %2 : i32
    %c1_i32 = arith.constant 1 : i32
    %12 = arith.addi %11, %c1_i32 : i32
    %13 = arith.index_cast %12 : i32 to index
    %14 = memref.load %arg1[%13] : memref<16xi32, #tpu.memory_space<smem>>
    %c0_i32_3 = arith.constant 0 : i32
    %c63_i32_4 = arith.constant 63 : i32
    %15 = arith.maxsi %c0_i32_3, %14 : i32
    %16 = arith.minsi %c63_i32_4, %15 : i32
    %17 = arith.index_cast %16 : i32 to index
    %c0_5 = arith.constant 0 : index
    %18 = vector.load %arg2[%17, %c0_5] : memref<64x128xf32, #tpu.memory_space<vmem>>, vector<1x128xf32>
    %19 = arith.addi %0, %2 : i32
    %c2_i32 = arith.constant 2 : i32
    %20 = arith.addi %19, %c2_i32 : i32
    %21 = arith.index_cast %20 : i32 to index
    %22 = memref.load %arg1[%21] : memref<16xi32, #tpu.memory_space<smem>>
    %c0_i32_6 = arith.constant 0 : i32
    %c63_i32_7 = arith.constant 63 : i32
    %23 = arith.maxsi %c0_i32_6, %22 : i32
    %24 = arith.minsi %c63_i32_7, %23 : i32
    %25 = arith.index_cast %24 : i32 to index
    %c0_8 = arith.constant 0 : index
    %26 = vector.load %arg2[%25, %c0_8] : memref<64x128xf32, #tpu.memory_space<vmem>>, vector<1x128xf32>
    %27 = arith.addi %0, %2 : i32
    %c3_i32 = arith.constant 3 : i32
    %28 = arith.addi %27, %c3_i32 : i32
    %29 = arith.index_cast %28 : i32 to index
    %30 = memref.load %arg1[%29] : memref<16xi32, #tpu.memory_space<smem>>
    %c0_i32_9 = arith.constant 0 : i32
    %c63_i32_10 = arith.constant 63 : i32
    %31 = arith.maxsi %c0_i32_9, %30 : i32
    %32 = arith.minsi %c63_i32_10, %31 : i32
    %33 = arith.index_cast %32 : i32 to index
    %c0_11 = arith.constant 0 : index
    %34 = vector.load %arg2[%33, %c0_11] : memref<64x128xf32, #tpu.memory_space<vmem>>, vector<1x128xf32>
    %35 = arith.addi %0, %2 : i32
    %c4_i32 = arith.constant 4 : i32
    %36 = arith.addi %35, %c4_i32 : i32
    %37 = arith.index_cast %36 : i32 to index
    %38 = memref.load %arg1[%37] : memref<16xi32, #tpu.memory_space<smem>>
    %c0_i32_12 = arith.constant 0 : i32
    %c63_i32_13 = arith.constant 63 : i32
    %39 = arith.maxsi %c0_i32_12, %38 : i32
    %40 = arith.minsi %c63_i32_13, %39 : i32
    %41 = arith.index_cast %40 : i32 to index
    %c0_14 = arith.constant 0 : index
    %42 = vector.load %arg2[%41, %c0_14] : memref<64x128xf32, #tpu.memory_space<vmem>>, vector<1x128xf32>
    %43 = arith.addi %0, %2 : i32
    %c5_i32 = arith.constant 5 : i32
    %44 = arith.addi %43, %c5_i32 : i32
    %45 = arith.index_cast %44 : i32 to index
    %46 = memref.load %arg1[%45] : memref<16xi32, #tpu.memory_space<smem>>
    %c0_i32_15 = arith.constant 0 : i32
    %c63_i32_16 = arith.constant 63 : i32
    %47 = arith.maxsi %c0_i32_15, %46 : i32
    %48 = arith.minsi %c63_i32_16, %47 : i32
    %49 = arith.index_cast %48 : i32 to index
    %c0_17 = arith.constant 0 : index
    %50 = vector.load %arg2[%49, %c0_17] : memref<64x128xf32, #tpu.memory_space<vmem>>, vector<1x128xf32>
    %51 = arith.addi %0, %2 : i32
    %c6_i32 = arith.constant 6 : i32
    %52 = arith.addi %51, %c6_i32 : i32
    %53 = arith.index_cast %52 : i32 to index
    %54 = memref.load %arg1[%53] : memref<16xi32, #tpu.memory_space<smem>>
    %c0_i32_18 = arith.constant 0 : i32
    %c63_i32_19 = arith.constant 63 : i32
    %55 = arith.maxsi %c0_i32_18, %54 : i32
    %56 = arith.minsi %c63_i32_19, %55 : i32
    %57 = arith.index_cast %56 : i32 to index
    %c0_20 = arith.constant 0 : index
    %58 = vector.load %arg2[%57, %c0_20] : memref<64x128xf32, #tpu.memory_space<vmem>>, vector<1x128xf32>
    %59 = arith.addi %0, %2 : i32
    %c7_i32 = arith.constant 7 : i32
    %60 = arith.addi %59, %c7_i32 : i32
    %61 = arith.index_cast %60 : i32 to index
    %62 = memref.load %arg1[%61] : memref<16xi32, #tpu.memory_space<smem>>
    %c0_i32_21 = arith.constant 0 : i32
    %c63_i32_22 = arith.constant 63 : i32
    %63 = arith.maxsi %c0_i32_21, %62 : i32
    %64 = arith.minsi %c63_i32_22, %63 : i32
    %65 = arith.index_cast %64 : i32 to index
    %c0_23 = arith.constant 0 : index
    %66 = vector.load %arg2[%65, %c0_23] : memref<64x128xf32, #tpu.memory_space<vmem>>, vector<1x128xf32>
    %67 = tpu.concatenate %10, %18, %26, %34, %42, %50, %58, %66 in 0 : vector<1x128xf32>, vector<1x128xf32>, vector<1x128xf32>, vector<1x128xf32>, vector<1x128xf32>, vector<1x128xf32>, vector<1x128xf32>, vector<1x128xf32> -> vector<8x128xf32>
    %cst = arith.constant 11.3137083 : f32
    %68 = vector.broadcast %cst : f32 to vector<8x128xf32>
    %69 = arith.mulf %67, %68 : vector<8x128xf32>
    %70 = arith.index_cast %2 : i32 to index
    %c0_24 = arith.constant 0 : index
    %71 = vector.load %arg3[%70, %c0_24] : memref<8x128xf32, #tpu.memory_space<vmem>>, vector<8x128xf32>
    tpu.vector_store %arg3[%70, %c0_24], %69 {strides = array<i32>} : memref<8x128xf32, #tpu.memory_space<vmem>>, vector<8x128xf32>,
    %c1_i32_25 = arith.constant 1 : i32
    return
  }
  func.func @transform_0(%arg0: i32, %arg1: memref<16xi32, #tpu.memory_space<smem>>) -> (i32, i32) {
    %c0_i32 = arith.constant 0 : i32
    %c0_i32_0 = arith.constant 0 : i32
    %c0_i32_1 = arith.constant 0 : i32
    return %c0_i32, %c0_i32_0 : i32, i32
  }
  func.func @transform_1(%arg0: i32, %arg1: memref<16xi32, #tpu.memory_space<smem>>) -> (i32, i32) {
    %c0_i32 = arith.constant 0 : i32
    %c0_i32_0 = arith.constant 0 : i32
    return %arg0, %c0_i32 : i32, i32
  }
}

</mosaic_0001>

<bundles_post_ra>
// kernel: tpu_custom_call.1
= control target key start
LH: loop header
LB: loop body
LE: loop exit
PB: predicated region body
PF: predicated region fallthrough
CT: control target
= control target key end

     0   :  { %s520_s9 = smov [#allocation3]   ;;  %s673_s0 = inlined_call_operand.hbm [shape: s32[16], index: 0, kind: input, shape index: {}]   ;;  %s674_s1 = inlined_call_operand.hbm [shape: f32[64,128], index: 1, kind: input, shape index: {}]   ;;  %s675_s2 = inlined_call_operand.hbm [shape: f32[16,128], index: 2, kind: output, shape index: {}]  }
   0x1   :  { %8 = dma.hbm_to_smem %s673_s0, 16, %s520_s9, [#allocation2] }
   0x2   :  { %494 = dma.done.wait [#allocation2], 16 }
   0x3   :  { %495 = vsyncadd [#allocation2], 4294967280 }
   0x4   :  { %10 = sfence }
   0x5   :  { %11 = vsyncpa [#allocation5], 0 }
   0x6   :  { %12 = vsyncpa [#allocation6], 0 }
   0x7   :  { %14 = vsyncpa [#allocation6 + $0x1], 0  ;;  %s543_s12 = smov 0   ;;  %s545_s13 = smov 0  }
   0x8   :  { %s547_s14 = smov 0   ;;  %s549_s15 = smov 0  }
   0x9 LB: > { %s564_s0 = sadd.s32 4294967295, %s518_s15   ;;  %s298_s16 = sadd.s32 4294967294, %s518_s15   ;;  %s518_s15 = sphi %s549_s15, %s683_s15   ;;  %s514_s14 = sphi %s547_s14, %s682_s14   ;;  %s510_s13 = sphi %s545_s13, %s681_s13   ;;  %s506_s12 = sphi %s543_s12, %s680_s12  }
   0xa   : > { %s568_s17 = sadd.s32 1, %s518_s15   ;;  %s48_s18 = sadd.s32 1, %s514_s14 }
   0xb   : > { %s45_s19 = ssub.s32 %s518_s15, %s568_s17  ;;  %p58_p0 = scmp.ne.s32.totalorder %s514_s14, %s510_s13 }
   0xc   : > { %p46_p1 = scmp.eq.s32.totalorder %s45_s19, 0  ;;  %p59_p2 = scmp.eq.s32.totalorder %s564_s0, 1 }
   0xd   : > { %p64_p3 = scmp.ne.s32.totalorder %s510_s13, %s506_s12  ;;  %p65_p4 = scmp.eq.s32.totalorder %s298_s16, 1 }
   0xe   : > { %s579_s20 = scalar_select %p46_p1, %s514_s14, %s48_s18  }
   0xf   : > { %p581_p5 = por %p59_p2, %p58_p0  ;;  %p585_p6 = por %p65_p4, %p64_p3 }
  0x10   : > { %p299_p7 = scmp.ge.s32.totalorder %s518_s15, 1  ;;  %p72_p8 = scmp.lt.s32.totalorder %s518_s15, 3 }
  0x11   : > { %s677_s22 = scalar_select %p585_p6, 1, 0 }
  0x12   : > { %p379_p9 = scmp.eq.s32.totalorder %s564_s0, 0  ;;  %p592_p10 = pnand %p299_p7, %p72_p8 }
  0x13   : > { %s521_s24 = smov [#allocation4]  }
  0x14   : > { %s84_s25 = sshll.u32 %s521_s24, 4  ;;  %p371_p11 = pneg %p592_p10  ;;  %s85_s25 = int_to_ptr.vmem [resolvable:$true] %s84_s25 }
  0x15   : > { %s437_s26 = scalar_lea.vmem %s85_s25, 1024  ;;  %p445_p3 = scmp.lt.s32.totalorder %s85_s25, %s85_s25 }
  0x16   : > { %p372_p12 = pnand %p379_p9, %p371_p11  ;;  %p438_p0 = scmp.ne.s32.totalorder %s85_s25, %s437_s26 }
  0x17   : > { %p446_p4 = scmp.lt.s32.totalorder %s437_s26, %s437_s26 }
  0x18   : > { %p428_p13 = pneg %p372_p12 }
  0x19   : > { %p447_p6 = por %p446_p4, %p445_p3 }
  0x1a   : > { %p440_p1 = pnand %p438_p0, %p428_p13 }
  0x1c   : > { %p441_p2 = pneg %p440_p1 }
  0x1e   : > { %p448_p7 = pnand %p447_p6, %p441_p2 }
  0x20   : > { %451 = shalt.err (!%p448_p7)
}
  0x21   : > { %s522_s27 = smov 128   ;;  %s523_s28 = smov 8  }
  0x22   : > { %374 = dma.hbm_to_vmem [thread:$0]  (!%p372_p12), %s674_s1, 1024, %s85_s25, [#allocation5], %s522_s27, %s522_s27, %s523_s28  }
  0x23   : > { %100 = sbr.rel (%p592_p10) target bundleno = 96 (0x60), region = 24 }
  0x28   : > { %497 = dma.done.wait (%p379_p9), [#allocation5], 1024  }
  0x29   : > { %499 = vsyncadd (%p379_p9), [#allocation5], 4294966272  ;;  %s610_s3 = sshll.u32 %s564_s0, 3  ;;  %vm201_vm0 = vcmask 1040384   ;;  %vm203_vm1 = vcmask 1041408   ;;  %vm205_vm2 = vcmask 1042432  }
  0x2a   : > { %s117_s4 = sld [smem:[#allocation3 + %s610_s3]]  ;;  %s124_s5 = sadd.s32 1, %s610_s3  ;;  %vm207_vm3 = vcmask 1043456   ;;  %vm209_vm4 = vcmask 1044480   ;;  %vm211_vm5 = vcmask 1045504   ;;  %vm213_vm6 = vcmask 1046528  }
  0x2b   : > { %s125_s6 = sld [smem:[#allocation3 + %s124_s5]]  ;;  %s132_s7 = sadd.s32 2, %s610_s3 }
  0x2c   : > { %s133_s8 = sld [smem:[#allocation3 + %s132_s7]]  ;;  %s140_s9 = sadd.s32 3, %s610_s3 }
  0x2d   : > { %s141_s10 = sld [smem:[#allocation3 + %s140_s9]]  ;;  %s148_s11 = sadd.s32 4, %s610_s3 }
  0x2e   : > { %s617_s16 = sld [smem:[#allocation3 + %s148_s11]]  ;;  %s156_s18 = sadd.s32 5, %s610_s3 }
  0x2f   : > { %s620_s19 = sld [smem:[#allocation3 + %s156_s18]]  ;;  %s164_s23 = sadd.s32 6, %s610_s3 }
  0x30   : > { %p118_p6 = scmp.gt.s32.totalorder %s117_s4, 0  ;;  %p305_p8 = scmp.lt.s32.totalorder %s117_s4, 63 }
  0x31   : > { %p126_p9 = scmp.gt.s32.totalorder %s125_s6, 0  ;;  %p310_p10 = scmp.lt.s32.totalorder %s125_s6, 63 }
  0x32   : > { %s685_s4 = smov (!%p118_p6, %s117_s4), 0  ;;  %p134_p11 = scmp.gt.s32.totalorder %s133_s8, 0 }
  0x33   : > { %s687_s4 = smov (!%p305_p8, %s685_s4), 63  ;;  %s689_s6 = smov (!%p126_p9, %s125_s6), 0 }
  0x34   : > { %s691_s6 = smov (!%p310_p10, %s689_s6), 63  ;;  %p315_p12 = scmp.lt.s32.totalorder %s133_s8, 63 }
  0x35   : > { %s135_s24 = scalar_select %p134_p11, %s133_s8, 0 }
  0x36   : > { %p142_p13 = scmp.gt.s32.totalorder %s141_s10, 0  ;;  %p320_p0 = scmp.lt.s32.totalorder %s141_s10, 63 }
  0x37   : > { %s693_s24 = smov (!%p315_p12, %s135_s24), 63  ;;  %p150_p1 = scmp.gt.s32.totalorder %s617_s16, 0 }
  0x38   : > { %s695_s10 = smov (!%p142_p13, %s141_s10), 0  ;;  %s130_s25 = scalar_lea.vmem [#allocation4], %s691_s6 }
  0x39   : > { %v131_v0 = vld [vmem:[%s130_s25] sm:$0x1]  ;;  %s697_s10 = smov (!%p320_p0, %s695_s10), 63  ;;  %p325_p2 = scmp.lt.s32.totalorder %s617_s16, 63 }
  0x3a   : > { %s151_s26 = scalar_select %p150_p1, %s617_s16, 0  ;;  %v181_v2 = vrot.slane %v131_v0, 7 }
  0x3b   : > { %s138_s27 = scalar_lea.vmem [#allocation4], %s693_s24  ;;  %p158_p3 = scmp.gt.s32.totalorder %s620_s19, 0 }
  0x3c   : > { %v139_v1 = vld [vmem:[%s138_s27] sm:$0x1]  ;;  %p330_p4 = scmp.lt.s32.totalorder %s620_s19, 63  ;;  %s122_s28 = scalar_lea.vmem [#allocation4], %s687_s4 }
  0x3d   : > { %v123_v3 = vld [vmem:[%s122_s28] sm:$0x1]  ;;  %s699_s26 = smov (!%p325_p2, %s151_s26), 63  ;;  %s701_s19 = smov (!%p158_p3, %s620_s19), 0  ;;  %v184_v5 = vrot.slane %v139_v1, 6 }
  0x3e   : > { %s146_s29 = scalar_lea.vmem [#allocation4], %s697_s10  ;;  %s165_s30 = sld [smem:[#allocation3 + %s164_s23]]  ;;  %v202_v6 = vsel %vm201_vm0, %v123_v3, %v181_v2 }
  0x3f   : > { %v147_v4 = vld [vmem:[%s146_s29] sm:$0x1]  ;;  %s703_s19 = smov (!%p330_p4, %s701_s19), 63  ;;  %s172_s5 = sadd.s32 7, %s610_s3  ;;  %v204_v9 = vsel %vm203_vm1, %v202_v6, %v184_v5 }
  0x40   : > { %s154_s6 = scalar_lea.vmem [#allocation4], %s699_s26  ;;  %s173_s7 = sld [smem:[#allocation3 + %s172_s5]]  ;;  %v187_v8 = vrot.slane %v147_v4, 5 }
  0x41   : > { %v155_v7 = vld [vmem:[%s154_s6] sm:$0x1]  ;;  %s112_s4 = sand.u32 1, %s510_s13   ;;  %s162_s8 = scalar_lea.vmem [#allocation4], %s703_s19 }
  0x42   : > { %v163_v10 = vld [vmem:[%s162_s8] sm:$0x1]  ;;  %v190_v11 = vrot.slane %v155_v7, 4  ;;  %s635_s9 = sshll.u32 %s112_s4, 3  ;;  %v206_v12 = vsel %vm205_vm2, %v204_v9, %v187_v8  ;;  %s346_s18 = sshll.u32 %s564_s0, 7 }
  0x43   : > { %v193_v13 = vrot.slane %v163_v10, 3  ;;  %s114_s11 = scalar_lea.vmem [#allocation7], %s635_s9  ;;  %s229_s24 = scalar_lea.hbm %s675_s2, %s346_s18 }
  0x44   : > { %p166_p7 = scmp.gt.s32.totalorder %s165_s30, 0  ;;  %p335_p6 = scmp.lt.s32.totalorder %s165_s30, 63  ;;  %v208_v14 = vsel %vm207_vm3, %v206_v12, %v190_v11 }
  0x45   : > { %v210_v16 = vsel %vm209_vm4, %v208_v14, %v193_v13  ;;  %s231_s16 = sshll.u32 %s114_s11, 4  ;;  %s218_s25 = scalar_lea.sflag [#allocation6], %s112_s4  ;;  %s232_s16 = int_to_ptr.vmem [resolvable:$true] %s231_s16 }
  0x46   : > { %s705_s30 = smov (!%p166_p7, %s165_s30), 0  ;;  %p174_p8 = scmp.gt.s32.totalorder %s173_s7, 0 }
  0x47   : > { %p340_p9 = scmp.lt.s32.totalorder %s173_s7, 63  ;;  %s707_s30 = smov (!%p335_p6, %s705_s30), 63 }
  0x48   : > { %s709_s7 = smov (!%p174_p8, %s173_s7), 0  ;;  %s170_s3 = scalar_lea.vmem [#allocation4], %s707_s30 }
  0x49   : > { %v171_v15 = vld [vmem:[%s170_s3] sm:$0x1]  ;;  %s711_s7 = smov (!%p340_p9, %s709_s7), 63  ;;  %s452_s26 = scalar_lea.vmem %s232_s16, 128 }
  0x4a   : > { %v196_v17 = vrot.slane %v171_v15, 2  ;;  %s178_s10 = scalar_lea.vmem [#allocation4], %s711_s7  ;;  %p453_p10 = scmp.ne.s32.totalorder %s232_s16, %s452_s26 }
  0x4b   : > { %v179_v18 = vld [vmem:[%s178_s10] sm:$0x1]  ;;  %s524_s27 = smov [#allocation7]  }
  0x4c   : > { %v212_v19 = vsel %vm211_vm5, %v210_v16, %v196_v17  ;;  %v199_v20 = vrot.slane %v179_v18, 1  ;;  %p454_p11 = pnand %p453_p10, %p581_p5  ;;  %s456_s28 = sshll.u32 %s524_s27, 4  ;;  %s457_s28 = int_to_ptr.vmem [resolvable:$false] %s456_s28 }
  0x4d   : > { %s458_s29 = scalar_lea.vmem %s457_s28, 256  ;;  %p459_p13 = scmp.lt.s32.totalorder %s232_s16, %s457_s28 }
  0x4e   : > { %v214_v21 = vsel %vm213_vm6, %v212_v19, %v199_v20  ;;  %p455_p12 = pneg %p454_p11  ;;  %p460_p0 = scmp.lt.s32.totalorder %s458_s29, %s452_s26 }
  0x4f   : > { %v215_v22 = vmul.f32 11.313708, %v214_v21 }
  0x50   : > { %p461_p1 = por %p460_p0, %p459_p13 }
  0x51   : > { %216 = vst [vmem:[%s114_s11] sm:$0xff] %v215_v22 }
  0x52   : > { %p462_p2 = pnand %p461_p1, %p455_p12 }
  0x54   : > { %465 = shalt.err (!%p462_p2)
}
  0x55   : > { %s466_s0 = scalar_lea.hbm %s229_s24, 128  ;;  %s470_s6 = scalar_lea.hbm %s675_s2, 256 }
  0x56   : > { %p467_p3 = scmp.ne.s32.totalorder %s229_s24, %s466_s0  ;;  %p471_p6 = scmp.lt.s32.totalorder %s229_s24, %s675_s2 }
  0x57   : > { %p472_p8 = scmp.lt.s32.totalorder %s470_s6, %s466_s0 }
  0x58   : > { %p468_p4 = pnand %p467_p3, %p581_p5 }
  0x59   : > { %p473_p9 = por %p472_p8, %p471_p6 }
  0x5a   : > { %p469_p7 = pneg %p468_p4 }
  0x5c   : > { %p474_p10 = pnand %p473_p9, %p469_p7 }
  0x5e   : > { %477 = shalt.err (!%p474_p10)
}
  0x5f   : > { %369 = dma.vmem_to_hbm [thread:$0]  (%p581_p5), %s232_s16, 128, %s229_s24, %s218_s25  }
  0x60 PF: > { %p381_p11 = scmp.ge.s32.totalorder %s518_s15, 2  ;;  %s243_s8 = sand.u32 1, %s506_s12  }
  0x61   : > { %p679_p12 = scmp.ne.s32.totalorder %s677_s22, 0  ;;  %s244_s9 = scalar_lea.sflag [#allocation6], %s243_s8 }
  0x63   : > { %p376_p13 = pnand %p381_p11, %p679_p12 }
  0x65   : > { %p377_p0 = pneg %p376_p13 }
  0x67   : > { %501 = dma.done.wait (%p377_p0), %s244_s9, 128  }
  0x68   : > { %503 = vsyncadd (%p377_p0), %s244_s9, 4294967168  ;;  %p17_p1 = scmp.ge.s32.totalorder %s568_s17, 4   ;;  %s680_s12 = smov %s510_s13 }
  0x69   : > { %s681_s13 = smov %s514_s14  ;;  %s682_s14 = smov %s579_s20 }
  0x6a   : > { %s683_s15 = smov %s568_s17  ;;  %19 = sbr.rel (!%p17_p1) target bundleno = 9 (0x9), region = 69 }
  0x6f   :  { %249 = vsyncpa [#allocation5], 1 }
  0x70   :  { %251 = vsyncpa [#allocation5 + $0x1], 1 }
  0x71   :  { %252 = vsyncpa [#allocation6], 1 }
  0x72   :  { %254 = vsyncpa [#allocation6 + $0x1], 1 }

</bundles_post_ra>
